<compile_context>
chip_gen: v6e
topology: v6e:2x2x1
jax: 0.10.0
libtpu: 0.0.40
codegen_flags: <defaults>
</compile_context>

<pallas_src>
import functools
from typing import NamedTuple

import numpy as np
import jax
import jax.numpy as jnp
from jax import lax
from jax.experimental import pallas as pl
from jax.experimental.pallas import tpu as pltpu


def _round_up(v, m):
    return ((v + m - 1) // m) * m


def _sublane_multiple(dtype):
    # Minimum sublane tile by element width: 8 (4B), 16 (2B), 32 (1B).
    return {4: 8, 2: 16, 1: 32}.get(np.dtype(dtype).itemsize, 8)


def _tpu_defaults():
    """Per-generation tile defaults and scoped-VMEM limit."""
    try:
        vmem_bytes = int(getattr(pltpu.get_tpu_info(), "vmem_capacity_bytes",
                                 64 << 20))
    except Exception:  # unknown chip / interpret mode -> conservative config
        vmem_bytes = 64 << 20
    if vmem_bytes >= (100 << 20):
        # v5e / v6e: 128 MiB VMEM -> big tiles, raised scoped-VMEM limit.
        return dict(tm=512, tn=1024, tk=1024, vmem_limit=64 << 20,
                    resident_bytes=8 << 20, fast_bytes=2 << 20)
    # v7x: 64 MiB per TensorCore -> keep the double-buffered footprint modest.
    return dict(tm=256, tn=1024, tk=512, vmem_limit=48 << 20,
                resident_bytes=4 << 20, fast_bytes=2 << 20)


# ---------------------------------------------------------------------------
# Kernels
# ---------------------------------------------------------------------------
def _fused_linear_kernel(x_ref, w_ref, b_ref, o_ref, *, compute_dtype):
    """Whole reduction dim in one tile: o = x @ W.T + b, no scratch."""
    acc = jnp.dot(x_ref[...].astype(compute_dtype),
                  w_ref[...].astype(compute_dtype),
                  preferred_element_type=jnp.float32)
    o_ref[...] = (acc + b_ref[...].astype(jnp.float32)).astype(o_ref.dtype)


def _tiled_linear_kernel(x_ref, w_ref, b_ref, o_ref, acc_ref, *, compute_dtype):
    """K tiled over the last ("arbitrary") grid axis with an f32 accumulator."""
    k = pl.program_id(2)

    @pl.when(k == 0)
    def _init():
        # Fold the bias into the init: saves a zero-fill pass plus a separate
        # finalize add per output tile.
        acc_ref[...] = jnp.broadcast_to(b_ref[...].astype(jnp.float32),
                                        acc_ref.shape)

    acc_ref[...] += jnp.dot(x_ref[...].astype(compute_dtype),
                            w_ref[...].astype(compute_dtype),
                            preferred_element_type=jnp.float32)

    @pl.when(k == pl.num_programs(2) - 1)
    def _store():
        o_ref[...] = acc_ref[...].astype(o_ref.dtype)


# ---------------------------------------------------------------------------
# Forward wrapper (jitted once; all shape / tile decisions are trace-time)
# ---------------------------------------------------------------------------
class _Cfg(NamedTuple):
    tm: int
    tn: int
    tk: int
    vmem_limit: int
    fast_bytes: int
    out_features: int
    compute_dtype: np.dtype


def _forward_impl(x, wt_pad, b_pad, *, cfg):
    orig_shape = x.shape
    d = orig_shape[-1]
    if x.ndim != 2:
        x = x.reshape(-1, d)
    n = x.shape[0]
    d_p, o_p = wt_pad.shape
    o = cfg.out_features
    out_dtype = x.dtype
    cdt = cfg.compute_dtype
    x_sz = np.dtype(x.dtype).itemsize
    c_sz = np.dtype(cdt).itemsize
    sub = _sublane_multiple(out_dtype)

    fused = functools.partial(_fused_linear_kernel, compute_dtype=cdt)

    # --- Fast path: tiny problems -> one block, no grid/pipelining machinery.
    n_s = _round_up(n, sub)
    tiny_bytes = n_s * d_p * x_sz + d_p * o_p * c_sz + n_s * o_p * x_sz + o_p * 4
    if tiny_bytes <= cfg.fast_bytes:
        x_p = jnp.pad(x, ((0, n_s - n), (0, d_p - d)))
        out = pl.pallas_call(
            fused,
            out_shape=jax.ShapeDtypeStruct((n_s, o_p), out_dtype),
        )(x_p, wt_pad, b_pad)
        return out[:n, :o].reshape(orig_shape[:-1] + (o,))

    # --- Tiled path: pick tm so the double-buffered set fits the VMEM cap. ---
    tn, tk = cfg.tn, cfg.tk
    grid_n, grid_k = o_p // tn, d_p // tk
    budget = int(cfg.vmem_limit * 0.7)
    w_tile = 2 * tk * tn * c_sz                        # double-buffered W tile
    per_row = 2 * tk * x_sz + 2 * tn * x_sz + tn * 4   # x + out (2-buf) + acc
    tm_cap = max(budget - w_tile, sub * per_row) // per_row
    tm_cap = max(sub, (tm_cap // sub) * sub)
    tm = max(sub, min(cfg.tm, tm_cap, _round_up(n, sub)))
    n_p = _round_up(n, tm)
    grid_m = n_p // tm

    # Megacore (v7x): make sure the parallel grid has >= 2 blocks when possible.
    if grid_m * grid_n < 2 and tm > sub:
        tm_half = max(sub, _round_up(tm // 2, sub))
        if _round_up(n, tm_half) // tm_half >= 2:
            tm = tm_half
            n_p = _round_up(n, tm)
            grid_m = n_p // tm

    x_p = jnp.pad(x, ((0, n_p - n), (0, d_p - d)))

    if grid_k == 1:
        # Whole reduction in one tile (includes weight-resident mode): no
        # accumulator scratch. W / bias index maps ignore i, so they stay
        # VMEM-resident across the whole M sweep when grid_n == 1.
        kernel = fused
        grid_spec = pltpu.PrefetchScalarGridSpec(
            num_scalar_prefetch=0,
            grid=(grid_m, grid_n),
            in_specs=[
                pl.BlockSpec((tm, tk), lambda i, j: (i, 0)),   # x tile
                pl.BlockSpec((tk, tn), lambda i, j: (0, j)),   # W.T tile
                pl.BlockSpec((1, tn), lambda i, j: (0, j)),    # bias
            ],
            out_specs=pl.BlockSpec((tm, tn), lambda i, j: (i, j)),
        )
        dims = ("parallel", "parallel")
    else:
        kernel = functools.partial(_tiled_linear_kernel, compute_dtype=cdt)
        grid_spec = pltpu.PrefetchScalarGridSpec(
            num_scalar_prefetch=0,
            grid=(grid_m, grid_n, grid_k),
            in_specs=[
                pl.BlockSpec((tm, tk), lambda i, j, k: (i, k)),  # x tile
                pl.BlockSpec((tk, tn), lambda i, j, k: (k, j)),  # W.T tile
                pl.BlockSpec((1, tn), lambda i, j, k: (0, j)),   # bias (K-res.)
            ],
            out_specs=pl.BlockSpec((tm, tn), lambda i, j, k: (i, j)),
            scratch_shapes=[pltpu.VMEM((tm, tn), jnp.float32)],
        )
        dims = ("parallel", "parallel", "arbitrary")

    out = pl.pallas_call(
        kernel,
        out_shape=jax.ShapeDtypeStruct((n_p, o_p), out_dtype),
        grid_spec=grid_spec,
        compiler_params=pltpu.CompilerParams(
            dimension_semantics=dims,
            vmem_limit_bytes=cfg.vmem_limit),
    )(x_p, wt_pad, b_pad)
    return out[:n, :o].reshape(orig_shape[:-1] + (o,))


_FORWARD = jax.jit(_forward_impl, static_argnames=("cfg",))


class RegLogitPallas:
    """Pallas-TPU equivalent of RegLogitModel.forward (a single nn.Linear).

    weight: [out_features, in_features]  (PyTorch nn.Linear convention)
    bias:   [out_features]
    compute_dtype: dtype fed to the MXU (e.g. jnp.bfloat16 on v6e/v7x for
        ~3-6x matmul throughput + half the DMA bytes); accumulation is f32.
    """

    def __init__(self, weight, bias, *, compute_dtype=None):
        weight = jnp.asarray(weight)
        bias = jnp.asarray(bias)
        o, d = weight.shape
        assert bias.shape == (o,)
        self.in_features, self.out_features = d, o

        defaults = _tpu_defaults()
        cdt = np.dtype(compute_dtype if compute_dtype is not None
                       else weight.dtype)

        d_128, o_128 = _round_up(d, 128), _round_up(o, 128)
        if d_128 * o_128 * cdt.itemsize <= defaults["resident_bytes"]:
            # Weight-resident mode: one tile covers all of W.T, so the grid
            # only streams over M and W is DMA'd from HBM exactly once.
            tk, tn = d_128, o_128
        else:
            tn = min(defaults["tn"], o_128)
            tk = min(defaults["tk"], d_128)
        d_p, o_p = _round_up(d, tk), _round_up(o, tn)

        self.cfg = _Cfg(tm=defaults["tm"], tn=tn, tk=tk,
                        vmem_limit=defaults["vmem_limit"],
                        fast_bytes=defaults["fast_bytes"],
                        out_features=o, compute_dtype=cdt)

        # One-time weight prep: transpose to [D, O], zero-pad to lane-dense
        # tile multiples, cast to the MXU feed dtype. Never repeated per call.
        wt = weight.T.astype(cdt)
        self.wt_pad = jnp.pad(wt, ((0, d_p - d), (0, o_p - o)))
        self.b_pad = jnp.pad(bias, (0, o_p - o)).reshape(1, o_p)

    def __call__(self, x):
        return _FORWARD(x, self.wt_pad, self.b_pad, cfg=self.cfg)


def init_params(key, input_dim, output_dim, dtype=jnp.float32):
    # Deterministic init mimicking nn.Linear's default U(-1/sqrt(in), 1/sqrt(in)).
    kw, kb = jax.random.split(key)
    bound = 1.0 / jnp.sqrt(jnp.asarray(input_dim, dtype))
    weight = jax.random.uniform(kw, (output_dim, input_dim), dtype,
                                minval=-bound, maxval=bound)
    bias = jax.random.uniform(kb, (output_dim,), dtype,
                              minval=-bound, maxval=bound)
    return weight, bias


if __name__ == "__main__":
    key = jax.random.PRNGKey(0)
    k1, k2, k3, k4, k5, k6 = jax.random.split(key, 6)

    # --- Toy shape from the module (hits the single-block fast path). ---
    batch, input_dim, output_dim = 8, 32, 4
    x1 = jax.random.normal(k1, (batch, input_dim), jnp.float32)
    w1, b1 = init_params(k2, input_dim, output_dim)
    model1 = RegLogitPallas(w1, b1)
    out1 = jax.block_until_ready(model1(x1))
    ref1 = jnp.dot(x1, w1.T, precision=lax.Precision.HIGHEST) + b1
    assert out1.shape == (batch, output_dim)
    assert jnp.allclose(out1, ref1, atol=1e-5, rtol=1e-5)

    # --- Medium shape: weight-resident mode, grid over M, padded O columns. --
    x2 = jax.random.normal(k3, (1024, 384), jnp.float32)
    w2, b2 = init_params(k4, 384, 200)
    model2 = RegLogitPallas(w2, b2)
    out2 = jax.block_until_ready(model2(x2))
    ref2 = jnp.dot(x2, w2.T, precision=lax.Precision.HIGHEST) + b2
    assert jnp.allclose(out2, ref2, atol=1e-4, rtol=1e-4)

    # Optional bf16 MXU feed (the v6e/v7x fast path); f32 accumulation.
    model2_bf16 = RegLogitPallas(w2, b2, compute_dtype=jnp.bfloat16)
    out2_bf16 = jax.block_until_ready(model2_bf16(x2))
    assert jnp.allclose(out2_bf16, ref2, atol=1e-1, rtol=1e-1)

    # --- Larger shape: K-tiled accumulator path with folded bias. ---
    x3 = jax.random.normal(k5, (512, 2048), jnp.float32)
    w3, b3 = init_params(k6, 2048, 1536)
    model3 = RegLogitPallas(w3, b3)
    out3 = jax.block_until_ready(model3(x3))
    ref3 = jnp.dot(x3, w3.T, precision=lax.Precision.HIGHEST) + b3
    assert jnp.allclose(out3, ref3, atol=1e-3, rtol=1e-3)

    print("KERNEL_OK")
</pallas_src>

<mosaic_0001>
module attributes {stable_mosaic.version = 11 : i64} {
  func.func @_fused_linear_kernel(%arg0: memref<8x128xf32, #tpu.memory_space<vmem>>, %arg1: memref<128x128xf32, #tpu.memory_space<vmem>>, %arg2: memref<1x128xf32, #tpu.memory_space<vmem>>, %arg3: memref<8x128xf32, #tpu.memory_space<vmem>>) attributes {dimension_semantics = [], scalar_prefetch = 0 : i64, scratch_operands = 0 : i64, tpu.core_type = #tpu.core_type<tc>} {
    %c0 = arith.constant 0 : index
    %c0_0 = arith.constant 0 : index
    %0 = vector.load %arg0[%c0, %c0_0] : memref<8x128xf32, #tpu.memory_space<vmem>>, vector<8x128xf32>
    %c0_1 = arith.constant 0 : index
    %c0_2 = arith.constant 0 : index
    %1 = vector.load %arg1[%c0_1, %c0_2] : memref<128x128xf32, #tpu.memory_space<vmem>>, vector<128x128xf32>
    %cst = arith.constant dense<0.000000e+00> : vector<8x128xf32>
    %2 = tpu.matmul %0, %1, %cst {dimension_numbers = #tpu.dot_dimension_numbers<[1], [0], [0], [1], [0, 0, 1, 1], [], []>} : vector<8x128xf32>, vector<128x128xf32>, vector<8x128xf32> -> vector<8x128xf32>
    %c0_3 = arith.constant 0 : index
    %c0_4 = arith.constant 0 : index
    %3 = vector.load %arg2[%c0_3, %c0_4] : memref<1x128xf32, #tpu.memory_space<vmem>>, vector<1x128xf32>
    %4 = vector.broadcast %3 : vector<1x128xf32> to vector<8x128xf32>
    %5 = arith.addf %2, %4 : vector<8x128xf32>
    %c0_5 = arith.constant 0 : index
    %c0_6 = arith.constant 0 : index
    %6 = vector.load %arg3[%c0_5, %c0_6] : memref<8x128xf32, #tpu.memory_space<vmem>>, vector<8x128xf32>
    tpu.vector_store %arg3[%c0_5, %c0_6], %5 {strides = array<i32>} : memref<8x128xf32, #tpu.memory_space<vmem>>, vector<8x128xf32>,
    return
  }
}

</mosaic_0001>

<bundles_post_ra>
// kernel: _forward_impl.1
= control target key start
LH: loop header
LB: loop body
LE: loop exit
PB: predicated region body
PF: predicated region fallthrough
CT: control target
= control target key end

     0   :  { %8 = vsyncpa [#allocation3], 0  ;;  %s208_s12 = smov [#allocation2]   ;;  %s245_s0 = inlined_call_operand.vmem [shape: f32[8,128], index: 0, kind: input, shape index: {}]   ;;  %s246_s1 = inlined_call_operand.hbm [shape: f32[128,128], index: 1, kind: input, shape index: {}]   ;;  %s247_s2 = inlined_call_operand.vmem [shape: f32[1,128], index: 2, kind: input, shape index: {}]   ;;  %s248_s3 = inlined_call_operand.vmem [shape: f32[8,128], index: 3, kind: output, shape index: {}]  }
   0x1   :  { %s16_s13 = sshll.u32 %s208_s12, 4  ;;  %s17_s13 = int_to_ptr.vmem [resolvable:$true] %s16_s13 }
   0x2   :  { %s194_s14 = scalar_lea.vmem %s17_s13, 2048  ;;  %p199_p1 = scmp.lt.s32.totalorder %s17_s13, %s17_s13 }
   0x3   :  { %p195_p0 = scmp.ne.s32.totalorder %s17_s13, %s194_s14  ;;  %p200_p2 = scmp.lt.s32.totalorder %s194_s14, %s194_s14 }
   0x5   :  { %p201_p3 = por %p200_p2, %p199_p1 }
   0x7   :  { %p202_p4 = pnand %p201_p3, %p195_p0 }
   0x9   :  { %205 = shalt.err (!%p202_p4)
}
   0xa   :  { %s209_s15 = smov 128   ;;  %s210_s16 = smov 8  }
   0xb   :  { %22 = dma.hbm_to_vmem [thread:$0]  %s246_s1, 2048, %s17_s13, [#allocation3], %s209_s15, %s209_s15, %s210_s16  }
   0xc   :  { %206 = dma.done.wait [#allocation3], 2048  }
   0xd   :  { %207 = vsyncadd [#allocation3], 4294965248  ;;  %v211_v0 = vmov 0.0   ;;  %vm212_vm0 = vmmov 0   ;;  %v44_v1 = vld [vmem:[#allocation2 + $0x78] sm:$0xff]  ;;  %v43_v2 = vld [vmem:[#allocation2 + $0x70] sm:$0xff] }
   0xe   :  { %146 = vmatprep.subr.mxu0 %v211_v0  ;;  %178 = vmatprep.mubr.msk.f32.mxu0 %vm212_vm0, %v211_v0  ;;  %v42_v3 = vld [vmem:[#allocation2 + $0x68] sm:$0xff]  ;;  %v41_v4 = vld [vmem:[#allocation2 + $0x60] sm:$0xff]  ;;  %v40_v5 = vld [vmem:[#allocation2 + $0x58] sm:$0xff] }
   0xf   :  { %147 = vmatpush3.msra.mxu0 %v44_v1  ;;  %v39_v6 = vld [vmem:[#allocation2 + $0x50] sm:$0xff]  ;;  %v38_v7 = vld [vmem:[#allocation2 + $0x48] sm:$0xff]  ;;  %v37_v8 = vld [vmem:[#allocation2 + $0x40] sm:$0xff] }
  0x10   :  { %148 = vmatprep.subr.mxu0 %v211_v0  ;;  %v36_v9 = vld [vmem:[#allocation2 + $0x38] sm:$0xff]  ;;  %v35_v10 = vld [vmem:[#allocation2 + $0x30] sm:$0xff]  ;;  %v34_v11 = vld [vmem:[#allocation2 + $0x28] sm:$0xff] }
  0x11   :  { %149 = vmatpush3.msra.mxu0 %v43_v2  ;;  %v33_v12 = vld [vmem:[#allocation2 + $0x20] sm:$0xff]  ;;  %v32_v13 = vld [vmem:[#allocation2 + $0x18] sm:$0xff]  ;;  %v31_v14 = vld [vmem:[#allocation2 + $0x10] sm:$0xff] }
  0x12   :  { %150 = vmatprep.subr.mxu0 %v211_v0  ;;  %v30_v15 = vld [vmem:[#allocation2 + $0x8] sm:$0xff]  ;;  %v29_v16 = vld [vmem:[#allocation2] sm:$0xff] }
  0x13   :  { %151 = vmatpush3.msra.mxu0 %v42_v3  ;;  %v28_v17 = vld [vmem:[%s245_s0] sm:$0xff] }
  0x14   :  { %152 = vmatprep.subr.mxu0 %v211_v0  ;;  %v128_v18 = vld [vmem:[%s247_s2] ss:$0 sm:$0xff] }
  0x15   :  { %153 = vmatpush3.msra.mxu0 %v41_v4 }
  0x16   :  { %154 = vmatprep.subr.mxu0 %v211_v0 }
  0x17   :  { %155 = vmatpush3.msra.mxu0 %v40_v5 }
  0x18   :  { %156 = vmatprep.subr.mxu0 %v211_v0 }
  0x19   :  { %157 = vmatpush3.msra.mxu0 %v39_v6 }
  0x1a   :  { %158 = vmatprep.subr.mxu0 %v211_v0 }
  0x1b   :  { %159 = vmatpush3.msra.mxu0 %v38_v7 }
  0x1c   :  { %160 = vmatprep.subr.mxu0 %v211_v0 }
  0x1d   :  { %161 = vmatpush3.msra.mxu0 %v37_v8 }
  0x1e   :  { %162 = vmatprep.subr.mxu0 %v211_v0 }
  0x1f   :  { %163 = vmatpush3.msra.mxu0 %v36_v9 }
  0x20   :  { %164 = vmatprep.subr.mxu0 %v211_v0 }
  0x21   :  { %165 = vmatpush3.msra.mxu0 %v35_v10 }
  0x22   :  { %166 = vmatprep.subr.mxu0 %v211_v0 }
  0x23   :  { %167 = vmatpush3.msra.mxu0 %v34_v11 }
  0x24   :  { %168 = vmatprep.subr.mxu0 %v211_v0 }
  0x25   :  { %169 = vmatpush3.msra.mxu0 %v33_v12 }
  0x26   :  { %170 = vmatprep.subr.mxu0 %v211_v0 }
  0x27   :  { %171 = vmatpush3.msra.mxu0 %v32_v13 }
  0x28   :  { %172 = vmatprep.subr.mxu0 %v211_v0 }
  0x29   :  { %173 = vmatpush3.msra.mxu0 %v31_v14 }
  0x2a   :  { %174 = vmatprep.subr.mxu0 %v211_v0 }
  0x2b   :  { %175 = vmatpush3.msra.mxu0 %v30_v15 }
  0x2c   :  { %176 = vmatprep.subr.mxu0 %v211_v0 }
  0x2d   :  { %177 = vmatpush3.msra.mxu0 %v29_v16 }
  0x2e   :  { %179 = vmatmul.mubr.f32.vlgmr.msra.gmra.mxu0 %v28_v17 }
  0xee   :  { %v118_v19 = vpop.f32.mrf.mxu0 }
  0xef   :  { %v119_v20 = vadd.f32 %v128_v18, %v118_v19 }
  0xf0   :  { %v180_v21 = vpop.f32.mrf.mxu0 }
  0xf1   :  { %122 = vst [vmem:[%s248_s3] sm:$0xff] %v119_v20 }
  0xf2   :  { %127 = vsyncpa [#allocation3], 1 }

</bundles_post_ra>
